<compile_context>
chip_gen: v7x
topology: tpu7x:2x2x1
jax: 0.10.0
libtpu: 0.0.40
codegen_flags: <defaults>
</compile_context>

<pallas_src>
import jax
import jax.numpy as jnp
from jax.experimental import pallas as pl
from jax.experimental.pallas import tpu as pltpu


# ---------------------------------------------------------------------------
# Positional table (built once, in the model dtype -> no per-call slice/cast cost)
# ---------------------------------------------------------------------------
def build_positional_table(num_hiddens: int, max_len: int = 1000,
                           dtype=jnp.float32) -> jnp.ndarray:
    """P of shape (max_len, num_hiddens), exactly as in the module's __init__."""
    pos = jnp.arange(max_len, dtype=jnp.float32).reshape(-1, 1)                      # (max_len, 1)
    div = jnp.power(10000.0,
                    jnp.arange(0, num_hiddens, 2, dtype=jnp.float32) / num_hiddens)  # (H//2,)
    ang = pos / div                                                                  # (max_len, H//2)
    P = jnp.zeros((max_len, num_hiddens), dtype=jnp.float32)
    P = P.at[:, 0::2].set(jnp.sin(ang))
    P = P.at[:, 1::2].set(jnp.cos(ang))
    return P.astype(dtype)


# ---------------------------------------------------------------------------
# Kernels
# ---------------------------------------------------------------------------
def _pe_add_2d_kernel(x_ref, p_ref, o_ref):
    # x: (tS, B*H), p: (tS, H).  Replicate P across the batch inside VMEM — the VPU/XLU
    # slots are idle in this bandwidth-bound kernel, and it keeps P's HBM traffic at S*H
    # instead of S*B*H (the old wrapper-side jnp.tile).
    reps = x_ref.shape[1] // p_ref.shape[1]
    p = p_ref[...]
    if reps > 1:
        p = jnp.tile(p, (1, reps))
    o_ref[...] = (x_ref[...] + p).astype(o_ref.dtype)


def _pe_add_3d_kernel(x_ref, p_ref, o_ref):
    # x: (tS, B, H), p: (tS, 1, H) — broadcast over the batch (sublane) dim.
    o_ref[...] = (x_ref[...] + p_ref[...]).astype(o_ref.dtype)


# ---------------------------------------------------------------------------
# Generation-aware budgets
# ---------------------------------------------------------------------------
def _vmem_budget():
    """(vmem_limit_bytes, target X-block bytes) derived from the TPU generation."""
    phys = 64 * 1024 * 1024                         # conservative default (v7x per-core VMEM)
    try:
        info = pltpu.get_tpu_info()
        phys = int(getattr(info, "vmem_capacity_bytes", phys)) or phys
    except Exception:
        pass
    if phys >= 128 * 1024 * 1024:                   # v5e / v6e: 128 MiB physical
        return 64 * 1024 * 1024, 8 * 1024 * 1024
    return 32 * 1024 * 1024, 4 * 1024 * 1024        # v7x: 64 MiB physical


_VMEM_LIMIT_BYTES, _TARGET_BLOCK_BYTES = _vmem_budget()


def _pick_tile_rows(seq_len: int, row_bytes: int, target_block_bytes: int) -> int:
    """Rows per X block: ~target bytes, multiple of 8 (or the full seq_len).
    When there is enough work (>=1 MiB), keep at least 2 grid steps so v7x's two
    TensorCores both get a share of the ("parallel",) sequence axis."""
    t = max(1, target_block_bytes // max(row_bytes, 1))
    if seq_len * row_bytes >= (1 << 20) and seq_len >= 16:
        t = min(t, -(-seq_len // 2))                # ceil(S/2) -> grid of >= 2 steps
    if t >= seq_len:
        return seq_len
    t = max(8, (t // 8) * 8)
    return seq_len if t >= seq_len else t


# ---------------------------------------------------------------------------
# Forward
# ---------------------------------------------------------------------------
@jax.jit
def positional_encoding_forward(X: jnp.ndarray, P_table: jnp.ndarray) -> jnp.ndarray:
    """Eval-mode forward.  X: (S, B, H); P_table: (max_len, H) with max_len >= S."""
    # TODO(synk): training-mode dropout (random mask + 1/(1-p) scaling) not implemented.
    S, B, H = X.shape
    max_len, Hp = P_table.shape
    assert Hp == H and max_len >= S, "P table must cover (seq_len, num_hiddens)"
    dtype = X.dtype

    tS = _pick_tile_rows(S, B * H * dtype.itemsize, _TARGET_BLOCK_BYTES)
    grid = (pl.cdiv(S, tS),)

    cparams = pltpu.CompilerParams(
        dimension_semantics=("parallel",),          # megacore sharding of the seq grid on v7x
        vmem_limit_bytes=_VMEM_LIMIT_BYTES,
    )
    cost = pl.CostEstimate(
        flops=S * B * H,
        transcendentals=0,
        bytes_accessed=2 * S * B * H * dtype.itemsize + S * H * P_table.dtype.itemsize,
    )

    if H % 128 == 0 and B >= 8:
        # Natural 3-D layout is already lane-dense (H mult. of 128) and sublane-full (B>=8).
        p3 = P_table.reshape(max_len, 1, H)         # free bitcast view
        return pl.pallas_call(
            _pe_add_3d_kernel,
            out_shape=jax.ShapeDtypeStruct((S, B, H), dtype),
            grid=grid,
            in_specs=[
                pl.BlockSpec((tS, B, H), lambda s: (s, 0, 0)),
                pl.BlockSpec((tS, 1, H), lambda s: (s, 0, 0)),   # only ~S*H bytes of P traffic
            ],
            out_specs=pl.BlockSpec((tS, B, H), lambda s: (s, 0, 0)),
            compiler_params=cparams,
            cost_estimate=cost,
            input_output_aliases={0: 0},
        )(X, p3)

    # Lane-dense / sublane-full 2-D path for small batch or unaligned H:
    # collapse (B, H) -> B*H (free row-major view).  P stays (max_len, H) in HBM; the
    # BlockSpec only ever fetches the first ~S rows; replication across B is in-kernel.
    BH = B * H
    x2 = X.reshape(S, BH)
    out2 = pl.pallas_call(
        _pe_add_2d_kernel,
        out_shape=jax.ShapeDtypeStruct((S, BH), dtype),
        grid=grid,
        in_specs=[
            pl.BlockSpec((tS, BH), lambda s: (s, 0)),
            pl.BlockSpec((tS, H), lambda s: (s, 0)),
        ],
        out_specs=pl.BlockSpec((tS, BH), lambda s: (s, 0)),
        compiler_params=cparams,
        cost_estimate=cost,
        input_output_aliases={0: 0},
    )(x2, P_table)
    return out2.reshape(S, B, H)


if __name__ == "__main__":
    # --- demo shape implied by the module: seq=8, batch=2, hidden=32 (2-D collapsed path)
    num_hiddens, max_len, seq_len, batch = 32, 1000, 8, 2
    dropout_p = 0.1  # unused at eval time

    P = build_positional_table(num_hiddens, max_len, dtype=jnp.float32)
    X = jax.random.normal(jax.random.PRNGKey(0), (seq_len, batch, num_hiddens), jnp.float32)
    out = jax.block_until_ready(positional_encoding_forward(X, P))
    ref = X + P[:seq_len][:, None, :]
    assert out.shape == X.shape
    assert jnp.allclose(out, ref, atol=1e-6), "mismatch vs reference (demo shape)"

    # --- multi-step grid + 3-D path (B >= 8, H % 128 == 0)
    H2, S2, B2 = 128, 512, 8
    P2 = build_positional_table(H2, max_len=S2)
    X2 = jax.random.normal(jax.random.PRNGKey(0), (S2, B2, H2), jnp.float32)
    out2 = jax.block_until_ready(positional_encoding_forward(X2, P2))
    ref2 = X2 + P2[:S2][:, None, :]
    assert jnp.allclose(out2, ref2, atol=1e-6), "mismatch vs reference (3-D path)"

    # --- small batch but lane-aligned H: exercises the extended 2-D path (in-kernel tile)
    H3, S3, B3 = 128, 64, 2
    P3 = build_positional_table(H3, max_len=256)
    X3 = jax.random.normal(jax.random.PRNGKey(0), (S3, B3, H3), jnp.float32)
    out3 = jax.block_until_ready(positional_encoding_forward(X3, P3))
    ref3 = X3 + P3[:S3][:, None, :]
    assert jnp.allclose(out3, ref3, atol=1e-6), "mismatch vs reference (small-batch 2-D path)"

    print("KERNEL_OK")
</pallas_src>

<mosaic_0001>
module attributes {stable_mosaic.version = 11 : i64} {
  func.func @_pe_add_2d_kernel(%arg0: i32, %arg1: memref<8x64xf32, #tpu.memory_space<vmem>>, %arg2: memref<8x32xf32, #tpu.memory_space<vmem>>, %arg3: memref<8x64xf32, #tpu.memory_space<vmem>>) attributes {dimension_semantics = [#tpu.dimension_semantics<parallel>], iteration_bounds = array<i64: 1>, scalar_prefetch = 0 : i64, scratch_operands = 0 : i64, tpu.core_type = #tpu.core_type<tc>, window_params = [{transform_indices = @transform_0, window_bounds = array<i64: 8, 64>}, {transform_indices = @transform_1, window_bounds = array<i64: 8, 32>}, {transform_indices = @transform_2, window_bounds = array<i64: 8, 64>}]} {
    %c0 = arith.constant 0 : index
    %c0_0 = arith.constant 0 : index
    %0 = vector.load %arg2[%c0, %c0_0] : memref<8x32xf32, #tpu.memory_space<vmem>>, vector<8x32xf32>
    %1 = tpu.concatenate %0, %0 in 1 : vector<8x32xf32>, vector<8x32xf32> -> vector<8x64xf32>
    %c0_1 = arith.constant 0 : index
    %c0_2 = arith.constant 0 : index
    %2 = vector.load %arg1[%c0_1, %c0_2] : memref<8x64xf32, #tpu.memory_space<vmem>>, vector<8x64xf32>
    %3 = arith.addf %2, %1 : vector<8x64xf32>
    %c0_3 = arith.constant 0 : index
    %c0_4 = arith.constant 0 : index
    %4 = vector.load %arg3[%c0_3, %c0_4] : memref<8x64xf32, #tpu.memory_space<vmem>>, vector<8x64xf32>
    tpu.vector_store %arg3[%c0_3, %c0_4], %3 {strides = array<i32>} : memref<8x64xf32, #tpu.memory_space<vmem>>, vector<8x64xf32>,
    return
  }
  func.func @transform_0(%arg0: i32) -> (i32, i32) {
    %c0_i32 = arith.constant 0 : i32
    %c0_i32_0 = arith.constant 0 : i32
    return %arg0, %c0_i32 : i32, i32
  }
  func.func @transform_1(%arg0: i32) -> (i32, i32) {
    %c0_i32 = arith.constant 0 : i32
    %c0_i32_0 = arith.constant 0 : i32
    return %arg0, %c0_i32 : i32, i32
  }
  func.func @transform_2(%arg0: i32) -> (i32, i32) {
    %c0_i32 = arith.constant 0 : i32
    %c0_i32_0 = arith.constant 0 : i32
    return %arg0, %c0_i32 : i32, i32
  }
}

</mosaic_0001>

<bundles_post_ra>
// kernel: positional_encoding_forward.1
= control target key start
LH: loop header
LB: loop body
LE: loop exit
PB: predicated region body
PF: predicated region fallthrough
CT: control target
= control target key end

     0   :  { %s27_s11 = smov 32   ;;  %vm16_vm0 = vcmask 261120   ;;  %vm20_vm1 = vcmask 523264   ;;  %s52_s1 = inlined_call_operand.vmem [shape: f32[1000,32], index: 1, kind: input, shape index: {}]   ;;  %s53_s0 = inlined_call_operand.vmem [shape: f32[8,64], index: 0, kind: input, shape index: {}, may-alias: {0,2}]   ;;  %s54_s2 = inlined_call_operand.vmem [shape: f32[8,64], index: 2, kind: output, shape index: {}, may-alias: {0,2}]  }
   0x1   :  { %v11_v0 = vld [vmem:[%s52_s1] sm:$0xff] }
   0x2   :  { %13 = vrot.lane.b32.xlu0 %v11_v0, %s27_s11  ;;  %v18_v1 = vld [vmem:[%s53_s0] sm:$0xff] }
  0x74   :  { %v14_v2 = vpop.permute.xlu0 %13 }
  0x75   :  { %v17_v3 = vsel %vm16_vm0, %v11_v0, %v14_v2 }
  0x76   :  { %v19_v4 = vadd.f32 %v18_v1, %v17_v3 }
  0x78   :  { %21 = vst.msk [vmem:[%s54_s2] sm:$0xff] %vm20_vm1, %v19_v4 }

</bundles_post_ra>
